<compile_context>
chip_gen: v5e
topology: v5e:2x2
jax: 0.10.0
libtpu: 0.0.40
codegen_flags: <defaults>
</compile_context>

<pallas_src>
import functools
import math

import jax
import jax.numpy as jnp
from jax.experimental import pallas as pl
from jax.experimental.pallas import tpu as pltpu


def _round_up(x, m):
    return ((x + m - 1) // m) * m


def _feedforward_kernel(x_ref, scale_ref, shift_ref, w_in_ref, w_out_ref, o_ref,
                        *, rms_scale, eps):
    """One row tile (TM, D_pad): RMSNorm -> proj_in -> FiLM -> proj_out."""
    x = x_ref[...].astype(jnp.float32)                              # (TM, Dp)

    # RMSNorm (scale=False): F.normalize(x, dim=-1) * sqrt(D).
    # rsqrt goes to the EUP slot; zero-padded columns contribute 0 to the sum.
    ssq = jnp.sum(x * x, axis=-1, keepdims=True)
    inv = jax.lax.rsqrt(jnp.maximum(ssq, eps * eps)) * rms_scale
    xn = x * inv

    # proj_in: Linear(D -> H, bias=False) + SiLU. bf16 operands, f32 accumulate.
    h = jnp.dot(xn.astype(w_in_ref.dtype), w_in_ref[...],
                preferred_element_type=jnp.float32)                 # (TM, H) f32
    h = h * jax.nn.sigmoid(h)                                       # SiLU in f32

    # FiLM modulation with per-row scale/shift (computed in the wrapper).
    h = h * (scale_ref[...] + 1.0) + shift_ref[...]

    # proj_out: Linear(H -> D, bias=False). Dropout p=0.0 is identity.
    y = jnp.dot(h.astype(w_out_ref.dtype), w_out_ref[...],
                preferred_element_type=jnp.float32)                 # (TM, Dp) f32
    o_ref[...] = y.astype(o_ref.dtype)


def feedforward(x, t, w_in, w_ss, b_ss, w_out, *, tm=256,
                matmul_dtype=jnp.bfloat16):
    """x: (B, N, D) float32, t: (B, C). Weights pre-transposed:
       w_in: (D, H), w_ss: (C, 2H), b_ss: (1, 2H), w_out: (H, D)."""
    B, N, D = x.shape
    H = w_in.shape[1]

    # ---- hoisted to_scale_shift (tiny M=1 matmul stays in plain JAX) ----
    ss = jax.nn.silu(t.astype(jnp.float32)) @ w_ss.astype(jnp.float32)
    ss = ss + b_ss.reshape(1, -1).astype(jnp.float32)               # (B, 2H)
    scale, shift = ss[:, :H], ss[:, H:]

    # ---- flatten (B, N) into rows; pre-broadcast FiLM params per row ----
    R = B * N
    tm_eff = min(tm, _round_up(R, 8))           # toy shapes -> single grid step
    R_pad = _round_up(R, tm_eff)
    D_pad = _round_up(D, 128)                   # lane-dense loads and stores

    x_rows = jnp.pad(x.reshape(R, D).astype(jnp.float32),
                     ((0, R_pad - R), (0, D_pad - D)))
    scale_rows = jnp.pad(
        jnp.broadcast_to(scale[:, None, :], (B, N, H)).reshape(R, H),
        ((0, R_pad - R), (0, 0)))
    shift_rows = jnp.pad(
        jnp.broadcast_to(shift[:, None, :], (B, N, H)).reshape(R, H),
        ((0, R_pad - R), (0, 0)))

    # Weights: bf16 MXU operands (f32 accumulate in-kernel), zero-padded to D_pad.
    w_in_p = jnp.pad(w_in, ((0, D_pad - D), (0, 0))).astype(matmul_dtype)    # (Dp, H)
    w_out_p = jnp.pad(w_out, ((0, 0), (0, D_pad - D))).astype(matmul_dtype)  # (H, Dp)

    kernel = functools.partial(_feedforward_kernel,
                               rms_scale=float(math.sqrt(D)), eps=1e-12)

    out = pl.pallas_call(
        kernel,
        out_shape=jax.ShapeDtypeStruct((R_pad, D_pad), x.dtype),
        grid=(R_pad // tm_eff,),
        in_specs=[
            pl.BlockSpec((tm_eff, D_pad), lambda i: (i, 0)),   # x rows
            pl.BlockSpec((tm_eff, H), lambda i: (i, 0)),       # FiLM scale per row
            pl.BlockSpec((tm_eff, H), lambda i: (i, 0)),       # FiLM shift per row
            pl.BlockSpec((D_pad, H), lambda i: (0, 0)),        # W_in (resident)
            pl.BlockSpec((H, D_pad), lambda i: (0, 0)),        # W_out (resident)
        ],
        out_specs=pl.BlockSpec((tm_eff, D_pad), lambda i: (i, 0)),
        compiler_params=pltpu.CompilerParams(
            dimension_semantics=("parallel",)),
        # NOTE: at real ViT sizes on v7x (64 MiB VMEM), add a K/H reduction grid
        # axis ("arbitrary") + f32 accumulator and set vmem_limit_bytes explicitly.
    )(x_rows, scale_rows, shift_rows, w_in_p, w_out_p)

    return out[:R, :D].reshape(B, N, D)


def feedforward_ref(x, t, w_in, w_ss, b_ss, w_out):
    """Pure-JAX (f32) reference of the PyTorch forward."""
    d = x.shape[-1]
    l2 = jnp.sqrt(jnp.sum(x * x, axis=-1, keepdims=True))
    xn = x / jnp.maximum(l2, 1e-12) * jnp.sqrt(jnp.float32(d))
    h = jax.nn.silu(xn @ w_in)
    ss = jax.nn.silu(t) @ w_ss + b_ss[0]
    H = w_in.shape[1]
    scale, shift = ss[:, :H], ss[:, H:]
    h = h * (scale[:, None, :] + 1.0) + shift[:, None, :]
    return h @ w_out


if __name__ == "__main__":
    # Small shapes: dim=32, mult=4 -> hidden=128, cond_dim=16, batch=2, seq=8.
    B, N, D, C, MULT = 2, 8, 32, 16, 4
    H = D * MULT

    key = jax.random.PRNGKey(0)
    kx, kt, k1, k2, k3, k4 = jax.random.split(key, 6)

    x = jax.random.normal(kx, (B, N, D), dtype=jnp.float32)
    t = jax.random.normal(kt, (B, C), dtype=jnp.float32)

    # Deterministic nonzero parameters (pre-transposed for row-major matmul).
    w_in = jax.random.normal(k1, (D, H), dtype=jnp.float32) * 0.05      # proj_in
    w_ss = jax.random.normal(k2, (C, 2 * H), dtype=jnp.float32) * 0.05  # to_scale_shift
    b_ss = jax.random.normal(k3, (1, 2 * H), dtype=jnp.float32) * 0.05
    w_out = jax.random.normal(k4, (H, D), dtype=jnp.float32) * 0.05     # proj_out

    out = jax.jit(feedforward)(x, t, w_in, w_ss, b_ss, w_out)
    out = jax.block_until_ready(out)

    ref = feedforward_ref(x, t, w_in, w_ss, b_ss, w_out)
    assert out.shape == (B, N, D)
    # bf16 matmul operands (f32 accumulate) -> loosened tolerance vs f32 reference.
    assert jnp.allclose(out, ref, rtol=2e-2, atol=2e-2), "mismatch vs pure-JAX reference"

    print("KERNEL_OK")
</pallas_src>

<mosaic_0001>
module attributes {stable_mosaic.version = 11 : i64} {
  func.func @_feedforward_kernel(%arg0: i32, %arg1: memref<16x128xf32, #tpu.memory_space<vmem>>, %arg2: memref<16x128xf32, #tpu.memory_space<vmem>>, %arg3: memref<16x128xf32, #tpu.memory_space<vmem>>, %arg4: memref<128x128xbf16, #tpu.memory_space<vmem>>, %arg5: memref<128x128xbf16, #tpu.memory_space<vmem>>, %arg6: memref<16x128xf32, #tpu.memory_space<vmem>>) attributes {dimension_semantics = [#tpu.dimension_semantics<parallel>], iteration_bounds = array<i64: 1>, scalar_prefetch = 0 : i64, scratch_operands = 0 : i64, tpu.core_type = #tpu.core_type<tc>, window_params = [{transform_indices = @transform_0, window_bounds = array<i64: 16, 128>}, {transform_indices = @transform_1, window_bounds = array<i64: 16, 128>}, {transform_indices = @transform_2, window_bounds = array<i64: 16, 128>}, {pipeline_mode = #tpu.pipeline_mode<synchronous>, transform_indices = @transform_3, window_bounds = array<i64: 128, 128>}, {pipeline_mode = #tpu.pipeline_mode<synchronous>, transform_indices = @transform_4, window_bounds = array<i64: 128, 128>}, {transform_indices = @transform_5, window_bounds = array<i64: 16, 128>}]} {
    %c0 = arith.constant 0 : index
    %c0_0 = arith.constant 0 : index
    %0 = vector.load %arg1[%c0, %c0_0] : memref<16x128xf32, #tpu.memory_space<vmem>>, vector<16x128xf32>
    %1 = arith.mulf %0, %0 : vector<16x128xf32>
    %cst = arith.constant dense<0.000000e+00> : vector<16xf32>
    %2 = vector.multi_reduction <add>, %1, %cst [1] : vector<16x128xf32> to vector<16xf32>
    %3 = vector.shape_cast %2 : vector<16xf32> to vector<16x1xf32>
    %cst_1 = arith.constant 1.000000e-24 : f32
    %4 = vector.broadcast %cst_1 : f32 to vector<16x1xf32>
    %5 = arith.maximumf %3, %4 : vector<16x1xf32>
    %6 = math.rsqrt %5 : vector<16x1xf32>
    %cst_2 = arith.constant 5.65685415 : f32
    %7 = vector.broadcast %cst_2 : f32 to vector<16x1xf32>
    %8 = arith.mulf %6, %7 : vector<16x1xf32>
    %9 = vector.broadcast %8 : vector<16x1xf32> to vector<16x128xf32>
    %10 = arith.mulf %0, %9 : vector<16x128xf32>
    %11 = arith.truncf %10 : vector<16x128xf32> to vector<16x128xbf16>
    %c0_3 = arith.constant 0 : index
    %c0_4 = arith.constant 0 : index
    %12 = vector.load %arg4[%c0_3, %c0_4] : memref<128x128xbf16, #tpu.memory_space<vmem>>, vector<128x128xbf16>
    %cst_5 = arith.constant dense<0.000000e+00> : vector<16x128xf32>
    %13 = tpu.matmul %11, %12, %cst_5 {dimension_numbers = #tpu.dot_dimension_numbers<[1], [0], [0], [1], [0, 0, 1, 1], [], []>} : vector<16x128xbf16>, vector<128x128xbf16>, vector<16x128xf32> -> vector<16x128xf32>
    %14 = arith.negf %13 : vector<16x128xf32>
    %15 = math.exp %14 : vector<16x128xf32>
    %cst_6 = arith.constant 1.000000e+00 : f32
    %16 = vector.broadcast %cst_6 : f32 to vector<16x128xf32>
    %17 = arith.addf %16, %15 : vector<16x128xf32>
    %18 = arith.divf %16, %17 : vector<16x128xf32>
    %19 = arith.mulf %13, %18 : vector<16x128xf32>
    %c0_7 = arith.constant 0 : index
    %c0_8 = arith.constant 0 : index
    %20 = vector.load %arg2[%c0_7, %c0_8] : memref<16x128xf32, #tpu.memory_space<vmem>>, vector<16x128xf32>
    %cst_9 = arith.constant 1.000000e+00 : f32
    %21 = vector.broadcast %cst_9 : f32 to vector<16x128xf32>
    %22 = arith.addf %20, %21 : vector<16x128xf32>
    %23 = arith.mulf %19, %22 : vector<16x128xf32>
    %c0_10 = arith.constant 0 : index
    %c0_11 = arith.constant 0 : index
    %24 = vector.load %arg3[%c0_10, %c0_11] : memref<16x128xf32, #tpu.memory_space<vmem>>, vector<16x128xf32>
    %25 = arith.addf %23, %24 : vector<16x128xf32>
    %26 = arith.truncf %25 : vector<16x128xf32> to vector<16x128xbf16>
    %c0_12 = arith.constant 0 : index
    %c0_13 = arith.constant 0 : index
    %27 = vector.load %arg5[%c0_12, %c0_13] : memref<128x128xbf16, #tpu.memory_space<vmem>>, vector<128x128xbf16>
    %cst_14 = arith.constant dense<0.000000e+00> : vector<16x128xf32>
    %28 = tpu.matmul %26, %27, %cst_14 {dimension_numbers = #tpu.dot_dimension_numbers<[1], [0], [0], [1], [0, 0, 1, 1], [], []>} : vector<16x128xbf16>, vector<128x128xbf16>, vector<16x128xf32> -> vector<16x128xf32>
    %c0_15 = arith.constant 0 : index
    %c0_16 = arith.constant 0 : index
    %29 = vector.load %arg6[%c0_15, %c0_16] : memref<16x128xf32, #tpu.memory_space<vmem>>, vector<16x128xf32>
    tpu.vector_store %arg6[%c0_15, %c0_16], %28 {strides = array<i32>} : memref<16x128xf32, #tpu.memory_space<vmem>>, vector<16x128xf32>,
    return
  }
  func.func @transform_0(%arg0: i32) -> (i32, i32) {
    %c0_i32 = arith.constant 0 : i32
    %c0_i32_0 = arith.constant 0 : i32
    return %arg0, %c0_i32 : i32, i32
  }
  func.func @transform_1(%arg0: i32) -> (i32, i32) {
    %c0_i32 = arith.constant 0 : i32
    %c0_i32_0 = arith.constant 0 : i32
    return %arg0, %c0_i32 : i32, i32
  }
  func.func @transform_2(%arg0: i32) -> (i32, i32) {
    %c0_i32 = arith.constant 0 : i32
    %c0_i32_0 = arith.constant 0 : i32
    return %arg0, %c0_i32 : i32, i32
  }
  func.func @transform_3(%arg0: i32) -> (i32, i32) {
    %c0_i32 = arith.constant 0 : i32
    %c0_i32_0 = arith.constant 0 : i32
    %c0_i32_1 = arith.constant 0 : i32
    return %c0_i32, %c0_i32_0 : i32, i32
  }
  func.func @transform_4(%arg0: i32) -> (i32, i32) {
    %c0_i32 = arith.constant 0 : i32
    %c0_i32_0 = arith.constant 0 : i32
    %c0_i32_1 = arith.constant 0 : i32
    return %c0_i32, %c0_i32_0 : i32, i32
  }
  func.func @transform_5(%arg0: i32) -> (i32, i32) {
    %c0_i32 = arith.constant 0 : i32
    %c0_i32_0 = arith.constant 0 : i32
    return %arg0, %c0_i32 : i32, i32
  }
}

</mosaic_0001>

<bundles_post_ra>
// kernel: feedforward.1
= control target key start
LH: loop header
LB: loop body
LE: loop exit
PB: predicated region body
PF: predicated region fallthrough
CT: control target
= control target key end

     0   :  { %s464_s0 = inlined_call_operand.vmem [shape: f32[16,128], index: 0, kind: input, shape index: {}]   ;;  %s465_s3 = inlined_call_operand.vmem [shape: bf16[128,128], index: 3, kind: input, shape index: {}]   ;;  %s466_s4 = inlined_call_operand.vmem [shape: bf16[128,128], index: 4, kind: input, shape index: {}]   ;;  %s467_s1 = inlined_call_operand.vmem [shape: f32[16,128], index: 1, kind: input, shape index: {}]   ;;  %s468_s2 = inlined_call_operand.vmem [shape: f32[16,128], index: 2, kind: input, shape index: {}]   ;;  %s469_s5 = inlined_call_operand.vmem [shape: f32[16,128], index: 5, kind: output, shape index: {}]  }
   0x1   :  { %v20_v0 = vld [vmem:[%s464_s0] sm:$0xff]  ;;  %v21_v2 = vld [vmem:[%s464_s0 + $0x8] sm:$0xff]  ;;  %v341_v4 = vld [vmem:[%s465_s3 + $0x38] sm:$0xff] }
   0x2   :  { %v22_v1 = vmul.f32 %v20_v0, %v20_v0  ;;  %v23_v3 = vmul.f32 %v21_v2, %v21_v2  ;;  %119 = vmatpush.bf16.msra.mxu0 %v341_v4  ;;  %v340_v5 = vld [vmem:[%s465_s3 + $0x30] sm:$0xff]  ;;  %v339_v6 = vld [vmem:[%s465_s3 + $0x28] sm:$0xff]  ;;  %v338_v7 = vld [vmem:[%s465_s3 + $0x20] sm:$0xff] }
   0x3   :  { %v337_v8 = vld [vmem:[%s465_s3 + $0x18] sm:$0xff]  ;;  %v336_v9 = vld [vmem:[%s465_s3 + $0x10] sm:$0xff]  ;;  %v335_v10 = vld [vmem:[%s465_s3 + $0x8] sm:$0xff] }
   0x4   :  { %24 = vadd.xlane.f32.xlu0 %v22_v1  ;;  %v334_v11 = vld [vmem:[%s465_s3] sm:$0xff]  ;;  %v349_v35 = vld [vmem:[%s466_s4 + $0x38] sm:$0xff]  ;;  %v348_v36 = vld [vmem:[%s466_s4 + $0x30] sm:$0xff] }
   0x5   :  { %248 = vmatpush.bf16.msra.mxu1 %v349_v35  ;;  %v347_v37 = vld [vmem:[%s466_s4 + $0x28] sm:$0xff]  ;;  %v346_v38 = vld [vmem:[%s466_s4 + $0x20] sm:$0xff]  ;;  %v345_v39 = vld [vmem:[%s466_s4 + $0x18] sm:$0xff] }
   0x6   :  { %120 = vmatpush.bf16.msra.mxu0 %v340_v5  ;;  %v344_v41 = vld [vmem:[%s466_s4 + $0x10] sm:$0xff]  ;;  %v343_v43 = vld [vmem:[%s466_s4 + $0x8] sm:$0xff]  ;;  %v342_v44 = vld [vmem:[%s466_s4] sm:$0xff] }
   0x7   :  { %v174_v4 = vld [vmem:[%s467_s1 + $0x8] sm:$0xff] }
   0x9   :  { %249 = vmatpush.bf16.msra.mxu1 %v348_v36 }
   0xa   :  { %121 = vmatpush.bf16.msra.mxu0 %v339_v6 }
   0xc   :  { %26 = vadd.xlane.f32.xlu0 %v23_v3 }
   0xd   :  { %250 = vmatpush.bf16.msra.mxu1 %v347_v37 }
   0xe   :  { %122 = vmatpush.bf16.msra.mxu0 %v338_v7 }
  0x11   :  { %251 = vmatpush.bf16.msra.mxu1 %v346_v38 }
  0x12   :  { %123 = vmatpush.bf16.msra.mxu0 %v337_v8 }
  0x15   :  { %252 = vmatpush.bf16.msra.mxu1 %v345_v39 }
  0x16   :  { %124 = vmatpush.bf16.msra.mxu0 %v336_v9 }
  0x19   :  { %253 = vmatpush.bf16.msra.mxu1 %v344_v41 }
  0x1a   :  { %125 = vmatpush.bf16.msra.mxu0 %v335_v10  ;;  %v176_v10 = vadd.f32 1.0, %v174_v4 }
  0x1d   :  { %254 = vmatpush.bf16.msra.mxu1 %v343_v43 }
  0x1e   :  { %126 = vmatpush.bf16.msra.mxu0 %v334_v11 }
  0x21   :  { %255 = vmatpush.bf16.msra.mxu1 %v342_v44 }
  0x77   :  { %v25_v12 = vpop.xlane.xlu0 %24 }
  0x78   :  { %v28_v13 = vmax.f32 %v25_v12, 1e-24 }
  0x7a   :  { %350 = vrsqrt.f32 %v28_v13  ;;  %vm36_vm1 = vweird.f32 %v28_v13 }
  0x7f   :  { %v27_v14 = vpop.xlane.xlu0 %26 }
  0x80   :  { %v351_v15 = vpop.eup %350  ;;  %v29_v16 = vmax.f32 %v27_v14, 1e-24  ;;  %v179_v14 = vld [vmem:[%s468_s2] sm:$0xff] }
  0x81   :  { %v31_v17 = vmul.f32 %v351_v15, %v28_v13  ;;  %vm37_vm0 = vweird.f32 %v351_v15 }
  0x82   :  { %352 = vrsqrt.f32 %v29_v16  ;;  %vm38_vm2 = vmor %vm36_vm1, %vm37_vm0  ;;  %vm46_vm4 = vweird.f32 %v29_v16 }
  0x83   :  { %v32_v18 = vmul.f32 %v351_v15, %v31_v17 }
  0x85   :  { %v33_v19 = vmul.f32 0.5, %v32_v18 }
  0x87   :  { %v34_v20 = vsub.f32 1.5, %v33_v19 }
  0x88   :  { %v353_v21 = vpop.eup %352 }
  0x89   :  { %v41_v22 = vmul.f32 %v353_v21, %v29_v16  ;;  %v35_v23 = vmul.f32 %v351_v15, %v34_v20  ;;  %vm47_vm3 = vweird.f32 %v353_v21 }
  0x8a   :  { %vm48_vm5 = vmor %vm46_vm4, %vm47_vm3 }
  0x8b   :  { %v42_v24 = vmul.f32 %v353_v21, %v41_v22  ;;  %v39_v27 = vsel %vm38_vm2, %v351_v15, %v35_v23  ;;  %v180_v15 = vld [vmem:[%s468_s2 + $0x8] sm:$0xff] }
  0x8c   :  { %v50_v29 = vmul.f32 5.656854, %v39_v27 }
  0x8d   :  { %v43_v25 = vmul.f32 0.5, %v42_v24 }
  0x8e   :  { %v52_v32 = vmul.f32 %v50_v29, %v20_v0  ;;  %v173_v0 = vld [vmem:[%s467_s1] sm:$0xff] }
  0x8f   :  { %v44_v26 = vsub.f32 1.5, %v43_v25  ;;  %v175_v6 = vadd.f32 1.0, %v173_v0 }
  0x91   :  { %v45_v28 = vmul.f32 %v353_v21, %v44_v26 }
  0x93   :  { %v49_v30 = vsel %vm48_vm5, %v353_v21, %v45_v28 }
  0x94   :  { %v51_v31 = vmul.f32 5.656854, %v49_v30 }
  0x96   :  { %v53_v33 = vmul.f32 %v51_v31, %v21_v2 }
  0x98   :  { %v54_v34 = vpack.c.bf16 %v53_v33, %v52_v32 }
  0x9a   :  { %127 = vmatmul.bf16.vlgmr.msra.gmra.mxu0 %v54_v34 }
 0x117   :  { %v128_v40 = vpop.f32.mrf.mxu0 }
 0x118   :  { %v300_v42 = vmul.f32 -1.442695, %v128_v40 }
 0x11a   :  { %354 = vpow2.f32 %v300_v42 }
 0x11f   :  { %v130_v45 = vpop.f32.mrf.mxu0 }
 0x120   :  { %v355_v46 = vpop.eup %354  ;;  %v301_v47 = vmul.f32 -1.442695, %v130_v45 }
 0x121   :  { %v139_v48 = vadd.f32 1.0, %v355_v46 }
 0x122   :  { %356 = vpow2.f32 %v301_v47 }
 0x123   :  { %358 = vrcp.f32 %v139_v48  ;;  %v152_v55 = vand.u32 2147483648, %v139_v48  ;;  %vm146_vm7 = vweird.f32 %v139_v48  ;;  %v150_v57 = vand.u32 2147483647, %v139_v48 }
 0x125   :  { %v153_v61 = vor.u32 1.1754944e-38, %v152_v55  ;;  %vm151_vm9 = vcmp.eq.f32.partialorder %v150_v57, 8.507059e+37 }
 0x128   :  { %v357_v49 = vpop.eup %356 }
 0x129   :  { %v359_v50 = vpop.eup %358  ;;  %v140_v51 = vadd.f32 1.0, %v357_v49 }
 0x12a   :  { %v142_v52 = vmul.f32 %v359_v50, %v139_v48  ;;  %vm147_vm6 = vweird.f32 %v359_v50 }
 0x12b   :  { %360 = vrcp.f32 %v140_v51  ;;  %vm148_vm8 = vmor %vm146_vm7, %vm147_vm6  ;;  %v167_v1 = vand.u32 2147483648, %v140_v51  ;;  %v165_v3 = vand.u32 2147483647, %v140_v51  ;;  %vm161_vm11 = vweird.f32 %v140_v51 }
 0x12c   :  { %v143_v53 = vsub.f32 1.0, %v142_v52 }
 0x12d   :  { %v168_v8 = vor.u32 1.1754944e-38, %v167_v1  ;;  %vm166_vm13 = vcmp.eq.f32.partialorder %v165_v3, 8.507059e+37 }
 0x12e   :  { %v144_v54 = vmul.f32 %v359_v50, %v143_v53 }
 0x130   :  { %v145_v56 = vadd.f32 %v359_v50, %v144_v54 }
 0x131   :  { %v361_v58 = vpop.eup %360 }
 0x132   :  { %v149_v59 = vsel %vm148_vm8, %v359_v50, %v145_v56  ;;  %v157_v60 = vmul.f32 %v361_v58, %v140_v51  ;;  %vm162_vm10 = vweird.f32 %v361_v58 }
 0x133   :  { %v154_v63 = vsel %vm151_vm9, %v153_v61, %v149_v59  ;;  %vm163_vm12 = vmor %vm161_vm11, %vm162_vm10 }
 0x134   :  { %v158_v62 = vsub.f32 1.0, %v157_v60  ;;  %v171_v5 = vmul.f32 %v154_v63, %v128_v40 }
 0x136   :  { %v159_v2 = vmul.f32 %v361_v58, %v158_v62  ;;  %v177_v12 = vmul.f32 %v175_v6, %v171_v5 }
 0x138   :  { %v160_v7 = vadd.f32 %v361_v58, %v159_v2  ;;  %v181_v17 = vadd.f32 %v179_v14, %v177_v12 }
 0x13a   :  { %v164_v9 = vsel %vm163_vm12, %v361_v58, %v160_v7 }
 0x13b   :  { %v169_v11 = vsel %vm166_vm13, %v168_v8, %v164_v9 }
 0x13c   :  { %v172_v13 = vmul.f32 %v169_v11, %v130_v45 }
 0x13e   :  { %v178_v16 = vmul.f32 %v176_v10, %v172_v13 }
 0x140   :  { %v182_v18 = vadd.f32 %v180_v15, %v178_v16 }
 0x142   :  { %v183_v19 = vpack.c.bf16 %v182_v18, %v181_v17 }
 0x144   :  { %256 = vmatmul.bf16.vlgmr.msra.gmra.mxu1 %v183_v19 }
 0x1c1   :  { %v257_v20 = vpop.f32.mrf.mxu1 }
 0x1c2   :  { %262 = vst [vmem:[%s469_s5] sm:$0xff] %v257_v20 }
 0x1c9   :  { %v259_v21 = vpop.f32.mrf.mxu1 }
 0x1ca   :  { %263 = vst [vmem:[%s469_s5 + $0x8] sm:$0xff] %v259_v21 }

</bundles_post_ra>
